<compile_context>
chip_gen: v7x
topology: tpu7x:2x2x1
jax: 0.10.0
libtpu: 0.0.40
codegen_flags: <defaults>
</compile_context>

<pallas_src>
import functools

import jax
import jax.numpy as jnp
from jax.experimental import pallas as pl
from jax.experimental.pallas import tpu as pltpu

NUM_HIDDENS = 300
LANE = 128


def _round_up(x, m):
    return ((x + m - 1) // m) * m


def critic_kernel(x_ref, w1_ref, b1_ref, w2_ref, b2_ref, q_ref, *, matmul_dtype):
    # x_ref : (TB, K)   fused [states | actions] batch tile          (VMEM)
    # w1_ref: (K, Hp)   fused, zero-padded first-layer weight        (VMEM, grid-resident)
    # b1_ref: (1, Hp)   zero-padded first-layer bias                 (VMEM, grid-resident)
    # w2_ref: (1, Hp)   second-layer weight stored as a padded row   (VMEM, grid-resident)
    # b2_ref: (1, 1)    second-layer bias scalar                     (SMEM)
    # q_ref : (TB, 1)
    x = x_ref[...].astype(matmul_dtype)
    w1 = w1_ref[...].astype(matmul_dtype)

    # Single MXU matmul over the fused K = state_dim + action_dim, f32 accumulate.
    y = jnp.dot(x, w1, preferred_element_type=jnp.float32)

    # Bias + relu on the VPU in f32 (padded lanes stay exactly 0 through relu).
    y = jnp.maximum(y + b1_ref[...], 0.0)

    # Linear(H, 1) as VPU mul + XLU lane reduce (avoids a 1-lane-wide MXU matmul).
    q = jnp.sum(y * w2_ref[...], axis=-1, keepdims=True) + b2_ref[0, 0]
    q_ref[...] = q.astype(q_ref.dtype)


def critic_forward(states, actions, w1_fused, b1_pad, w2_row, b2,
                   *, block_b=512, matmul_dtype=jnp.float32):
    """Forward pass. `w1_fused/b1_pad/w2_row/b2` come from `fuse_params`."""
    B = states.shape[0]
    # One cheap concat in the wrapper replaces a whole matmul + add in-kernel.
    x = jnp.concatenate([states, actions], axis=-1)          # (B, K)
    K = x.shape[1]
    Hp = w1_fused.shape[1]

    tb = B if B <= block_b else block_b                      # batch tile
    grid = (pl.cdiv(B, tb),)

    kernel = functools.partial(critic_kernel, matmul_dtype=matmul_dtype)

    flops = 2 * B * K * Hp + 4 * B * Hp
    bytes_accessed = 4 * (x.size + w1_fused.size + b1_pad.size
                          + w2_row.size + b2.size + B)

    return pl.pallas_call(
        kernel,
        out_shape=jax.ShapeDtypeStruct((B, 1), jnp.float32),
        grid=grid,
        in_specs=[
            pl.BlockSpec((tb, K), lambda i: (i, 0)),            # batch tile of fused input
            pl.BlockSpec((K, Hp), lambda i: (0, 0)),            # weights stay VMEM-resident
            pl.BlockSpec((1, Hp), lambda i: (0, 0)),
            pl.BlockSpec((1, Hp), lambda i: (0, 0)),
            pl.BlockSpec(memory_space=pltpu.MemorySpace.SMEM),  # (1,1) bias scalar in SMEM
        ],
        out_specs=pl.BlockSpec((tb, 1), lambda i: (i, 0)),
        compiler_params=pltpu.CompilerParams(
            dimension_semantics=("parallel",)),
        cost_estimate=pl.CostEstimate(
            flops=flops, transcendentals=0, bytes_accessed=bytes_accessed),
    )(x, w1_fused, b1_pad, w2_row, b2)


def init_params(key, state_dim, action_dim, num_hiddens=NUM_HIDDENS):
    """Deterministic synthetic init mirroring the PyTorch __init__ layouts."""
    k1, k2, k3 = jax.random.split(key, 3)
    w1_s = jax.random.normal(k1, (state_dim, num_hiddens), jnp.float32) * 0.001
    w1_a = jax.random.normal(k2, (action_dim, num_hiddens), jnp.float32) * 0.001
    b1 = jnp.zeros((1, num_hiddens), jnp.float32)
    # nn.Linear(num_hiddens, 1): weight ~ N(0, 0.001), bias = 0
    w2 = jax.random.normal(k3, (num_hiddens, 1), jnp.float32) * 0.001
    b2 = jnp.zeros((1, 1), jnp.float32)
    return w1_s, w1_a, b1, w2, b2


def fuse_params(w1_s, w1_a, b1, w2, b2, lane=LANE):
    """One-time re-layout for the kernel:
       - stack [w1_s; w1_a] into one (K, H) first-layer weight (one MXU matmul)
       - store the Linear weight as a (1, H) row (VPU mul + lane reduce)
       - zero-pad H (300) to a lane multiple (384); exact through relu/reduce."""
    H = w1_s.shape[1]
    pad = _round_up(H, lane) - H
    w1_fused = jnp.pad(jnp.concatenate([w1_s, w1_a], axis=0), ((0, 0), (0, pad)))
    b1_pad = jnp.pad(b1, ((0, 0), (0, pad)))
    w2_row = jnp.pad(w2.T, ((0, 0), (0, pad)))
    return w1_fused, b1_pad, w2_row, b2


def reference_forward(states, actions, w1_s, w1_a, b1, w2, b2):
    y = jnp.maximum(states @ w1_s + actions @ w1_a + b1, 0.0)
    return y @ w2 + b2


if __name__ == "__main__":
    key = jax.random.PRNGKey(0)
    k_s, k_a, k_p, k_s2, k_a2 = jax.random.split(key, 5)

    B, STATE_DIM, ACTION_DIM = 2, 16, 4
    states = jax.random.normal(k_s, (B, STATE_DIM), jnp.float32)
    actions = jax.random.normal(k_a, (B, ACTION_DIM), jnp.float32)
    torch_params = init_params(k_p, STATE_DIM, ACTION_DIM)
    fused = fuse_params(*torch_params)

    # Small-batch check (single grid step, exact f32 path).
    q = critic_forward(states, actions, *fused)
    jax.block_until_ready(q)
    q_ref = reference_forward(states, actions, *torch_params)
    assert q.shape == (B, 1)
    assert jnp.allclose(q, q_ref, atol=1e-5, rtol=1e-5)

    # Larger batch to exercise the parallel batch grid (2 tiles of 512 rows).
    B2 = 1024
    states2 = jax.random.normal(k_s2, (B2, STATE_DIM), jnp.float32)
    actions2 = jax.random.normal(k_a2, (B2, ACTION_DIM), jnp.float32)
    q2 = critic_forward(states2, actions2, *fused, block_b=512)
    jax.block_until_ready(q2)
    q2_ref = reference_forward(states2, actions2, *torch_params)
    assert q2.shape == (B2, 1)
    assert jnp.allclose(q2, q2_ref, atol=1e-5, rtol=1e-5)

    print("KERNEL_OK")
</pallas_src>

<mosaic_0001>
module attributes {stable_mosaic.version = 11 : i64} {
  func.func @critic_kernel(%arg0: i32, %arg1: memref<2x20xf32, #tpu.memory_space<vmem>>, %arg2: memref<20x384xf32, #tpu.memory_space<vmem>>, %arg3: memref<1x384xf32, #tpu.memory_space<vmem>>, %arg4: memref<1x384xf32, #tpu.memory_space<vmem>>, %arg5: memref<1x1xf32, #tpu.memory_space<smem>>, %arg6: memref<2x1xf32, #tpu.memory_space<vmem>>) attributes {dimension_semantics = [#tpu.dimension_semantics<parallel>], iteration_bounds = array<i64: 1>, scalar_prefetch = 0 : i64, scratch_operands = 0 : i64, tpu.core_type = #tpu.core_type<tc>, window_params = [{transform_indices = @transform_0, window_bounds = array<i64: 2, 20>}, {pipeline_mode = #tpu.pipeline_mode<synchronous>, transform_indices = @transform_1, window_bounds = array<i64: 20, 384>}, {pipeline_mode = #tpu.pipeline_mode<synchronous>, transform_indices = @transform_2, window_bounds = array<i64: 1, 384>}, {pipeline_mode = #tpu.pipeline_mode<synchronous>, transform_indices = @transform_3, window_bounds = array<i64: 1, 384>}, {transform_indices = @transform_4, window_bounds = array<i64: 1, 1>}, {transform_indices = @transform_5, window_bounds = array<i64: 2, 1>}]} {
    %c0 = arith.constant 0 : index
    %c0_0 = arith.constant 0 : index
    %0 = vector.load %arg1[%c0, %c0_0] : memref<2x20xf32, #tpu.memory_space<vmem>>, vector<2x20xf32>
    %c0_1 = arith.constant 0 : index
    %c0_2 = arith.constant 0 : index
    %1 = vector.load %arg2[%c0_1, %c0_2] : memref<20x384xf32, #tpu.memory_space<vmem>>, vector<20x384xf32>
    %cst = arith.constant dense<0.000000e+00> : vector<2x384xf32>
    %2 = tpu.matmul %0, %1, %cst {dimension_numbers = #tpu.dot_dimension_numbers<[1], [0], [0], [1], [0, 0, 1, 1], [], []>} : vector<2x20xf32>, vector<20x384xf32>, vector<2x384xf32> -> vector<2x384xf32>
    %c0_3 = arith.constant 0 : index
    %c0_4 = arith.constant 0 : index
    %3 = vector.load %arg3[%c0_3, %c0_4] : memref<1x384xf32, #tpu.memory_space<vmem>>, vector<1x384xf32>
    %4 = vector.broadcast %3 : vector<1x384xf32> to vector<2x384xf32>
    %5 = arith.addf %2, %4 : vector<2x384xf32>
    %cst_5 = arith.constant 0.000000e+00 : f32
    %6 = vector.broadcast %cst_5 : f32 to vector<2x384xf32>
    %7 = arith.maximumf %5, %6 : vector<2x384xf32>
    %c0_6 = arith.constant 0 : index
    %c0_7 = arith.constant 0 : index
    %8 = vector.load %arg4[%c0_6, %c0_7] : memref<1x384xf32, #tpu.memory_space<vmem>>, vector<1x384xf32>
    %9 = vector.broadcast %8 : vector<1x384xf32> to vector<2x384xf32>
    %10 = arith.mulf %7, %9 : vector<2x384xf32>
    %cst_8 = arith.constant dense<0.000000e+00> : vector<2xf32>
    %11 = vector.multi_reduction <add>, %10, %cst_8 [1] : vector<2x384xf32> to vector<2xf32>
    %12 = vector.shape_cast %11 : vector<2xf32> to vector<2x1xf32>
    %c0_9 = arith.constant 0 : index
    %c0_10 = arith.constant 0 : index
    %13 = memref.load %arg5[%c0_9, %c0_10] : memref<1x1xf32, #tpu.memory_space<smem>>
    %14 = vector.broadcast %13 : f32 to vector<2x1xf32>
    %15 = arith.addf %12, %14 : vector<2x1xf32>
    %c0_11 = arith.constant 0 : index
    %c0_12 = arith.constant 0 : index
    %16 = vector.load %arg6[%c0_11, %c0_12] : memref<2x1xf32, #tpu.memory_space<vmem>>, vector<2x1xf32>
    tpu.vector_store %arg6[%c0_11, %c0_12], %15 {strides = array<i32>} : memref<2x1xf32, #tpu.memory_space<vmem>>, vector<2x1xf32>,
    return
  }
  func.func @transform_0(%arg0: i32) -> (i32, i32) {
    %c0_i32 = arith.constant 0 : i32
    %c0_i32_0 = arith.constant 0 : i32
    return %arg0, %c0_i32 : i32, i32
  }
  func.func @transform_1(%arg0: i32) -> (i32, i32) {
    %c0_i32 = arith.constant 0 : i32
    %c0_i32_0 = arith.constant 0 : i32
    %c0_i32_1 = arith.constant 0 : i32
    return %c0_i32, %c0_i32_0 : i32, i32
  }
  func.func @transform_2(%arg0: i32) -> (i32, i32) {
    %c0_i32 = arith.constant 0 : i32
    %c0_i32_0 = arith.constant 0 : i32
    %c0_i32_1 = arith.constant 0 : i32
    return %c0_i32, %c0_i32_0 : i32, i32
  }
  func.func @transform_3(%arg0: i32) -> (i32, i32) {
    %c0_i32 = arith.constant 0 : i32
    %c0_i32_0 = arith.constant 0 : i32
    %c0_i32_1 = arith.constant 0 : i32
    return %c0_i32, %c0_i32_0 : i32, i32
  }
  func.func @transform_4(%arg0: i32) -> (i32, i32) {
    %c0_i32 = arith.constant 0 : i32
    %c0_i32_0 = arith.constant 0 : i32
    %c0_i32_1 = arith.constant 0 : i32
    return %c0_i32, %c0_i32_0 : i32, i32
  }
  func.func @transform_5(%arg0: i32) -> (i32, i32) {
    %c0_i32 = arith.constant 0 : i32
    %c0_i32_0 = arith.constant 0 : i32
    return %arg0, %c0_i32 : i32, i32
  }
}

</mosaic_0001>

<bundles_post_ra>
// kernel: tpu_custom_call.1
= control target key start
LH: loop header
LB: loop body
LE: loop exit
PB: predicated region body
PF: predicated region fallthrough
CT: control target
= control target key end

     0   :  { %11 = vsyncpa [#allocation4], 0  ;;  %s431_s0 = inlined_call_operand.hbm [shape: f32[2,20], index: 0, kind: input, shape index: {}]   ;;  %s432_s1 = inlined_call_operand.hbm [shape: f32[20,384], index: 1, kind: input, shape index: {}]   ;;  %s433_s2 = inlined_call_operand.vmem [shape: f32[1,384], index: 2, kind: input, shape index: {}]   ;;  %s434_s3 = inlined_call_operand.vmem [shape: f32[1,384], index: 3, kind: input, shape index: {}]   ;;  %s435_s4 = inlined_call_operand.<no memory space> [shape: f32[1,1], index: 4, kind: input, shape index: {}]   ;;  %s436_s5 = inlined_call_operand.vmem [shape: f32[2,1], index: 5, kind: output, shape index: {}]  }
   0x1   :  { %12 = vsyncpa [#allocation6], 0  ;;  %s351_s18 = smov [#allocation3]   ;;  %s352_s20 = smov [#allocation5]  }
   0x2   :  { %s19_s19 = sshll.u32 %s351_s18, 4  ;;  %s28_s21 = sshll.u32 %s352_s20, 4  ;;  %s20_s19 = int_to_ptr.vmem [resolvable:$true] %s19_s19  ;;  %s388_s21 = int_to_ptr.vmem [resolvable:$true] %s28_s21 }
   0x3   :  { %s303_s24 = scalar_lea.hbm %s431_s0, 32 }
   0x4   :  { %p304_p0 = scmp.ne.s32.totalorder %s431_s0, %s303_s24  ;;  %p307_p1 = scmp.lt.u32.totalorder %s303_s24, %s431_s0 }
   0x6   :  { %p309_p2 = pnand %p307_p1, %p304_p0 }
   0x8   :  { %312 = shalt.err (!%p309_p2)
}
   0x9   :  { %s313_s29 = scalar_lea.vmem %s20_s19, 32  ;;  %p318_p4 = scmp.lt.s32.totalorder %s20_s19, %s20_s19 }
   0xa   :  { %p314_p3 = scmp.ne.s32.totalorder %s20_s19, %s313_s29  ;;  %p319_p5 = scmp.lt.s32.totalorder %s313_s29, %s313_s29 }
   0xc   :  { %p320_p6 = por %p319_p5, %p318_p4 }
   0xe   :  { %p321_p7 = pnand %p320_p6, %p314_p3 }
  0x10   :  { %324 = shalt.err (!%p321_p7)
}
  0x11   :  { %22 = dma.hbm_to_vmem [thread:$0]  %s431_s0, 32, %s20_s19, [#allocation4]  }
  0x12   :  { %s325_s9 = scalar_lea.hbm %s432_s1, 1152 }
  0x13   :  { %p326_p8 = scmp.ne.s32.totalorder %s432_s1, %s325_s9  ;;  %p329_p9 = scmp.lt.u32.totalorder %s325_s9, %s432_s1 }
  0x15   :  { %p331_p10 = pnand %p329_p9, %p326_p8 }
  0x17   :  { %334 = shalt.err (!%p331_p10)
}
  0x18   :  { %s335_s14 = scalar_lea.vmem %s388_s21, 1152  ;;  %p340_p12 = scmp.lt.s32.totalorder %s388_s21, %s388_s21 }
  0x19   :  { %p336_p11 = scmp.ne.s32.totalorder %s388_s21, %s335_s14  ;;  %p341_p13 = scmp.lt.s32.totalorder %s335_s14, %s335_s14 }
  0x1b   :  { %p342_p0 = por %p341_p13, %p340_p12 }
  0x1d   :  { %p343_p1 = pnand %p342_p0, %p336_p11 }
  0x1f   :  { %346 = shalt.err (!%p343_p1)
}
  0x20   :  { %s353_s0 = smov 384   ;;  %s354_s15 = smov 24  }
  0x21   :  { %34 = dma.hbm_to_vmem [thread:$0]  %s432_s1, 1152, %s388_s21, [#allocation6], %s353_s0, %s353_s0, %s354_s15  }
  0x22   :  { %347 = dma.done.wait [#allocation4], 32  }
  0x23   :  { %348 = vsyncadd [#allocation4], 4294967264 }
  0x24   :  { %349 = dma.done.wait [#allocation6], 1152  }
  0x25   :  { %350 = vsyncadd [#allocation6], 4294966144  ;;  %v355_v0 = vmov 0.0|0.0   ;;  %v356_v1 = vmov 0.0   ;;  %vm357_vm0 = vmmov 0   ;;  %v49_v2 = vld [vmem:[#allocation5 + $0x8] sm:$0xff]  ;;  %v59_v15 = vlaneseq }
  0x26   :  { %293 = vmatprep.subr.bf16.mxu1 %v355_v0  ;;  %152 = vmatprep.mubr.f32.mxu0 %v356_v1  ;;  %v52_v3 = vld [vmem:[#allocation5 + $0x20] sm:$0xff]  ;;  %v51_v6 = vld [vmem:[#allocation5 + $0x18] sm:$0xff]  ;;  %v50_v7 = vld [vmem:[#allocation5 + $0x10] sm:$0xff]  ;;  %vm78_vm1 = vcmask 1043456   ;;  %vm74_vm2 = vcmask 162816   ;;  %vm252_vm3 = vcmask 1041408   ;;  %v261_v46 = vstv %s435_s4 }
  0x27   :  { %286 = vmatprep.mubr.msk.f32.mxu1 %vm357_vm0, %v356_v1  ;;  %v48_v4 = vld [vmem:[#allocation5] sm:$0xff]  ;;  %v289_v5 = vpack.c.bf16 %v52_v3, %v49_v2  ;;  %v53_v8 = vld [vmem:[#allocation5 + $0x28] sm:$0xff]  ;;  %v55_v11 = vld [vmem:[#allocation5 + $0x38] sm:$0xf]  ;;  %v60_v16 = vshrl.u32 %v59_v15, 7  ;;  %vm263_vm4 = vcmask 1024  }
  0x28   :  { %v291_v9 = vpack.c.bf16 %v51_v6, %v48_v4  ;;  %v294_v10 = vpack.c.bf16 %v53_v8, %v50_v7  ;;  %v54_v12 = vld [vmem:[#allocation5 + $0x30] sm:$0xf]  ;;  %v56_v13 = vld [vmem:[#allocation5 + $0x40] sm:$0xf]  ;;  %v47_v14 = vld [vmem:[#allocation3] sm:$0x3] }
  0x29   :  { %290 = vmatprep.subr.bf16.mxu0 %v289_v5  ;;  %v61_v17 = vsub.s32 0, %v60_v16  ;;  %v69_v18 = vsub.s32 2, %v60_v16  ;;  %v57_v19 = vld [vmem:[%s433_s2] sm:$0x7]  ;;  %v65_v20 = vsub.s32 1, %v60_v16 }
  0x2a   :  { %292 = vmatpush1.bf16.msra.mxu0 %v291_v9  ;;  %295 = vmatpush3.bf16.msra.mxu1 %v294_v10  ;;  %v232_v23 = vld [vmem:[%s434_s3] sm:$0x7] }
  0x2b   :  { %271 = vmatprep.subr.msk.mxu0 %vm78_vm1, %v55_v11  ;;  %284 = vmatprep.subr.mxu1 %v356_v1  ;;  %v62_v21 = vrot.slane %v57_v19, %v61_v17  ;;  %v70_v22 = vrot.slane %v57_v19, %v69_v18  ;;  %v66_v24 = vrot.slane %v57_v19, %v65_v20 }
  0x2c   :  { %v237_v28 = vrot.slane %v232_v23, %v61_v17  ;;  %v245_v32 = vrot.slane %v232_v23, %v69_v18  ;;  %v241_v34 = vrot.slane %v232_v23, %v65_v20 }
  0x2e   :  { %272 = vmatpush1.msk.msra.mxu0 %vm78_vm1, %v54_v12  ;;  %285 = vmatpush3.msk.msra.mxu1 %vm78_vm1, %v56_v13 }
  0x2f   :  { %273 = vmatmul.mubr.msk.f32.vlgmr.msra.gmra.mrb[0].mxu0 %vm74_vm2, %v47_v14  ;;  %287 = vmatmul.mubr.msk.f32.vlgmr.msra.gmra.mrb[0].mxu1 %vm74_vm2, %v47_v14 }
 0x102   :  { %v154_v25 = vpop.f32.mrb[0].mxu0  ;;  %v225_v26 = vpop.f32.mrb[0].mxu1 }
 0x103   :  { %v155_v27 = vadd.f32 %v154_v25, %v62_v21  ;;  %v156_v29 = vpop.f32.mrb[1].mxu0  ;;  %v226_v30 = vadd.f32 %v225_v26, %v70_v22  ;;  %v288_v31 = vpop.f32.mrb[1].mxu1 }
 0x104   :  { %v157_v33 = vadd.f32 %v156_v29, %v66_v24 }
 0x105   :  { %v229_v35 = vmax.f32 %v155_v27, 0.0  ;;  %v231_v36 = vmax.f32 %v226_v30, 0.0 }
 0x106   :  { %v230_v37 = vmax.f32 %v157_v33, 0.0 }
 0x107   :  { %v249_v38 = vmul.f32 %v237_v28, %v229_v35  ;;  %v251_v39 = vmul.f32 %v245_v32, %v231_v36 }
 0x108   :  { %v250_v40 = vmul.f32 %v241_v34, %v230_v37 }
 0x109   :  { %v253_v41 = vsel %vm252_vm3, %v249_v38, 0.0  ;;  %v256_v43 = vsel %vm252_vm3, %v251_v39, 0.0 }
 0x10a   :  { %v254_v42 = vsel %vm252_vm3, %v250_v40, 0.0 }
 0x10b   :  { %v255_v44 = vadd.f32 %v254_v42, %v253_v41 }
 0x10d   :  { %v257_v45 = vadd.f32 %v256_v43, %v255_v44 }
 0x10f   :  { %258 = vadd.xlane.f32.xlu0 %v257_v45 }
 0x19c   :  { %v259_v47 = vpop.xlane.xlu0 %258 }
 0x19d   :  { %v262_v48 = vadd.f32 %v261_v46, %v259_v47 }
 0x19f   :  { %264 = vst.msk [vmem:[%s436_s5] sm:$0x3] %vm263_vm4, %v262_v48 }
 0x1a0   :  { %269 = vsyncpa [#allocation4], 1 }
 0x1a1   :  { %270 = vsyncpa [#allocation6], 1 }

</bundles_post_ra>
